<compile_context>
chip_gen: v7x
topology: tpu7x:2x2x1
jax: 0.10.0
libtpu: 0.0.40
codegen_flags: <defaults>
</compile_context>

<pallas_src>
import functools

import jax
import jax.numpy as jnp
from jax.experimental import pallas as pl
from jax.experimental.pallas import tpu as pltpu


def _attention_kernel(x_ref, wqkv_ref, bqkv_ref, wout_ref, bout_ref, o_ref, *,
                      num_heads, head_dim, b_tile, seq, compute_dtype):
    E = num_heads * head_dim
    rows = b_tile * seq

    # ---- fused, lane-dense QKV projection: (rows, E) @ (E, 3E), f32 acc ----
    x2d = x_ref[...].reshape(rows, E).astype(compute_dtype)
    qkv = jnp.dot(x2d, wqkv_ref[...],
                  preferred_element_type=jnp.float32) + bqkv_ref[...]  # (rows, 3E)
    # NOTE: 1/sqrt(D) is already folded into the Q columns (wrapper side).

    # ---- attention core, batched over the b_tile batch elements ------------
    head_outs = []
    for h in range(num_heads):   # small static loop over heads: only lane
        # slicing differs per head; all b_tile batch elements are processed
        # together, and only one head's scores are live at a time.
        lo = h * head_dim
        q_h = qkv[:, lo:lo + head_dim].reshape(b_tile, seq, head_dim)
        k_h = qkv[:, E + lo:E + lo + head_dim].reshape(b_tile, seq, head_dim)
        v_h = qkv[:, 2 * E + lo:2 * E + lo + head_dim].reshape(b_tile, seq, head_dim)

        # Scores: batched QK^T, contraction on D (no explicit transpose).
        s = jnp.einsum('bqd,bkd->bqk',
                       q_h.astype(compute_dtype), k_h.astype(compute_dtype),
                       preferred_element_type=jnp.float32)          # (b, S, S)

        # Numerically stable softmax along the key axis (f32).
        m = jnp.max(s, axis=-1, keepdims=True)
        e = jnp.exp(s - m)
        denom = jnp.sum(e, axis=-1, keepdims=True)
        inv = pl.reciprocal(denom, approx=True)                     # EUP slot
        inv = inv * (2.0 - denom * inv)                             # Newton refine
        p = e * inv

        o_h = jnp.einsum('bqk,bkd->bqd',
                         p.astype(compute_dtype), v_h.astype(compute_dtype),
                         preferred_element_type=jnp.float32)        # (b, S, D)
        head_outs.append(o_h)

    # ---- output projection: heads concatenated on lanes, reduction over
    #      H*D = E handled inside one MXU matmul ----------------------------
    attn = jnp.concatenate(head_outs, axis=-1).reshape(rows, E)     # (rows, E)
    out = jnp.dot(attn.astype(compute_dtype), wout_ref[...],
                  preferred_element_type=jnp.float32) + bout_ref[...]

    o_ref[...] = out.reshape(b_tile, seq, E).astype(o_ref.dtype)


def _vmem_step_bytes(b_tile, seq, num_heads, head_dim):
    """Rough per-grid-step VMEM estimate (f32 worst case)."""
    E = num_heads * head_dim
    rows = b_tile * seq
    io = 2 * 2 * rows * E * 4                         # double-buffered x + out
    w = 2 * (E * 3 * E + 3 * E + E * E + E) * 4       # weight / bias blocks
    inter = (rows * 3 * E                             # fused qkv activations
             + 3 * b_tile * seq * seq                 # one head's s / e / p
             + 2 * rows * E) * 4                      # head outputs + proj out
    return io + w + inter


def _pick_b_tile(batch, seq, num_heads, head_dim, budget_bytes=40 << 20):
    """Largest batch tile fitting the VMEM budget; prefer an even grid >= 2."""
    divisors = [d for d in range(1, batch + 1) if batch % d == 0]
    fits = [d for d in divisors
            if _vmem_step_bytes(d, seq, num_heads, head_dim) <= budget_bytes]
    if not fits:
        fits = [1]
    # v7x has 2 TensorCores: an even grid of >= 2 parallel steps keeps both busy.
    pref = [d for d in fits if (batch // d) >= 2 and (batch // d) % 2 == 0]
    return max(pref if pref else fits)


def xformers_attention_pallas(x, w_qkv, b_qkv, w_out, b_out, num_heads,
                              compute_dtype=jnp.float32):
    B, S, E = x.shape
    H = num_heads
    D = E // H
    assert D * H == E, "embed_dim must be divisible by num_heads"

    # --- wrapper-side parameter prep (pure XLA, one time, outside the kernel) ---
    # Fold the softmax scale into the Q columns of the fused QKV weight/bias.
    scale = 1.0 / (D ** 0.5)
    col_scale = jnp.concatenate(
        [jnp.full((E,), scale, dtype=jnp.float32),
         jnp.ones((2 * E,), dtype=jnp.float32)])
    w_qkv_s = (w_qkv.astype(jnp.float32) * col_scale[None, :]).astype(compute_dtype)
    b_qkv_s = (b_qkv.astype(jnp.float32) * col_scale).reshape(1, 3 * E)   # f32
    w_out_c = w_out.astype(compute_dtype)
    b_out2 = b_out.astype(jnp.float32).reshape(1, E)                      # f32
    x_c = x.astype(compute_dtype)

    b_tile = _pick_b_tile(B, S, H, D)
    grid = (B // b_tile,)
    vmem_limit = int(min(max(2 * _vmem_step_bytes(b_tile, S, H, D), 32 << 20),
                         48 << 20))

    kernel = functools.partial(_attention_kernel, num_heads=H, head_dim=D,
                               b_tile=b_tile, seq=S, compute_dtype=compute_dtype)

    return pl.pallas_call(
        kernel,
        out_shape=jax.ShapeDtypeStruct((B, S, E), x.dtype),
        grid_spec=pltpu.PrefetchScalarGridSpec(
            num_scalar_prefetch=0,
            grid=grid,
            in_specs=[
                pl.BlockSpec((b_tile, S, E), lambda b: (b, 0, 0)),  # x
                pl.BlockSpec((E, 3 * E), lambda b: (0, 0)),         # W_qkv (scaled)
                pl.BlockSpec((1, 3 * E), lambda b: (0, 0)),         # b_qkv (scaled)
                pl.BlockSpec((E, E), lambda b: (0, 0)),             # W_out
                pl.BlockSpec((1, E), lambda b: (0, 0)),             # b_out
            ],
            out_specs=pl.BlockSpec((b_tile, S, E), lambda b: (b, 0, 0)),
        ),
        compiler_params=pltpu.CompilerParams(
            dimension_semantics=("parallel",),
            vmem_limit_bytes=vmem_limit),
    )(x_c, w_qkv_s, b_qkv_s, w_out_c, b_out2)


def reference_forward(x, w_qkv, b_qkv, w_out, b_out, num_heads):
    """Pure-JAX reference mirroring the PyTorch forward (f32)."""
    B, S, E = x.shape
    D = E // num_heads
    qkv = jnp.einsum("bse,ef->bsf", x, w_qkv) + b_qkv
    q, k, v = jnp.split(qkv, 3, axis=-1)

    def to_heads(t):
        return t.reshape(B, S, num_heads, D).transpose(0, 2, 1, 3)  # (B,H,S,D)

    q, k, v = to_heads(q), to_heads(k), to_heads(v)
    scores = jnp.einsum("bhqd,bhkd->bhqk", q, k) / jnp.sqrt(jnp.float32(D))
    p = jax.nn.softmax(scores, axis=-1)
    o = jnp.einsum("bhqk,bhkd->bhqd", p, v)                          # (B,H,S,D)
    o = o.transpose(0, 2, 1, 3).reshape(B, S, E)
    return jnp.einsum("bse,ef->bsf", o, w_out) + b_out


if __name__ == "__main__":
    # Small shapes consistent with the module's forward: (batch, seq, embed).
    batch, seq, embed, num_heads = 2, 8, 32, 4

    key = jax.random.PRNGKey(0)
    kx, kw1, kb1, kw2, kb2 = jax.random.split(key, 5)

    x = jax.random.normal(kx, (batch, seq, embed), dtype=jnp.float32)

    # Deterministic parameter init (weights stored as (in, out)).
    w_qkv = jax.random.normal(kw1, (embed, 3 * embed), dtype=jnp.float32) * 0.05
    b_qkv = jax.random.normal(kb1, (3 * embed,), dtype=jnp.float32) * 0.01
    w_out = jax.random.normal(kw2, (embed, embed), dtype=jnp.float32) * 0.05
    b_out = jax.random.normal(kb2, (embed,), dtype=jnp.float32) * 0.01

    ref = reference_forward(x, w_qkv, b_qkv, w_out, b_out, num_heads)

    # f32 compute path: tight numerical check against the reference.
    out = xformers_attention_pallas(x, w_qkv, b_qkv, w_out, b_out, num_heads)
    out = jax.block_until_ready(out)
    assert out.shape == (batch, seq, embed)
    assert jnp.allclose(out, ref, atol=1e-3, rtol=1e-3), "f32 mismatch vs reference"

    # bf16 matmul operands with f32 accumulation (2-4x MXU throughput on
    # v6e/v7x); softmax stays f32.  Loose tolerance = reduced-precision path.
    out_bf16 = xformers_attention_pallas(x, w_qkv, b_qkv, w_out, b_out,
                                         num_heads, compute_dtype=jnp.bfloat16)
    out_bf16 = jax.block_until_ready(out_bf16)
    assert jnp.allclose(out_bf16, ref, atol=1e-2, rtol=5e-2), "bf16 mismatch vs reference"

    print("KERNEL_OK")
</pallas_src>

<mosaic_0001>
module attributes {stable_mosaic.version = 11 : i64} {
  func.func @_attention_kernel(%arg0: i32, %arg1: memref<1x8x32xf32, #tpu.memory_space<vmem>>, %arg2: memref<32x96xf32, #tpu.memory_space<vmem>>, %arg3: memref<1x96xf32, #tpu.memory_space<vmem>>, %arg4: memref<32x32xf32, #tpu.memory_space<vmem>>, %arg5: memref<1x32xf32, #tpu.memory_space<vmem>>, %arg6: memref<1x8x32xf32, #tpu.memory_space<vmem>>) attributes {dimension_semantics = [#tpu.dimension_semantics<parallel>], iteration_bounds = array<i64: 2>, scalar_prefetch = 0 : i64, scratch_operands = 0 : i64, tpu.core_type = #tpu.core_type<tc>, window_params = [{transform_indices = @transform_0, window_bounds = array<i64: 1, 8, 32>}, {pipeline_mode = #tpu.pipeline_mode<synchronous>, transform_indices = @transform_1, window_bounds = array<i64: 32, 96>}, {pipeline_mode = #tpu.pipeline_mode<synchronous>, transform_indices = @transform_2, window_bounds = array<i64: 1, 96>}, {pipeline_mode = #tpu.pipeline_mode<synchronous>, transform_indices = @transform_3, window_bounds = array<i64: 32, 32>}, {pipeline_mode = #tpu.pipeline_mode<synchronous>, transform_indices = @transform_4, window_bounds = array<i64: 1, 32>}, {transform_indices = @transform_5, window_bounds = array<i64: 1, 8, 32>}]} {
    %c0 = arith.constant 0 : index
    %c0_0 = arith.constant 0 : index
    %c0_1 = arith.constant 0 : index
    %0 = vector.load %arg1[%c0, %c0_0, %c0_1] : memref<1x8x32xf32, #tpu.memory_space<vmem>>, vector<1x8x32xf32>
    %1 = vector.shape_cast %0 : vector<1x8x32xf32> to vector<8x32xf32>
    %c0_2 = arith.constant 0 : index
    %c0_3 = arith.constant 0 : index
    %2 = vector.load %arg2[%c0_2, %c0_3] : memref<32x96xf32, #tpu.memory_space<vmem>>, vector<32x96xf32>
    %cst = arith.constant dense<0.000000e+00> : vector<8x96xf32>
    %3 = tpu.matmul %1, %2, %cst {dimension_numbers = #tpu.dot_dimension_numbers<[1], [0], [0], [1], [0, 0, 1, 1], [], []>} : vector<8x32xf32>, vector<32x96xf32>, vector<8x96xf32> -> vector<8x96xf32>
    %c0_4 = arith.constant 0 : index
    %c0_5 = arith.constant 0 : index
    %4 = vector.load %arg3[%c0_4, %c0_5] : memref<1x96xf32, #tpu.memory_space<vmem>>, vector<1x96xf32>
    %5 = vector.broadcast %4 : vector<1x96xf32> to vector<8x96xf32>
    %6 = arith.addf %3, %5 : vector<8x96xf32>
    %7 = vector.extract_strided_slice %6 {offsets = [0, 0], sizes = [8, 8], strides = [1, 1]} : vector<8x96xf32> to vector<8x8xf32>
    %8 = vector.shape_cast %7 : vector<8x8xf32> to vector<1x8x8xf32>
    %9 = vector.extract_strided_slice %6 {offsets = [0, 32], sizes = [8, 8], strides = [1, 1]} : vector<8x96xf32> to vector<8x8xf32>
    %10 = vector.shape_cast %9 : vector<8x8xf32> to vector<1x8x8xf32>
    %11 = vector.extract_strided_slice %6 {offsets = [0, 64], sizes = [8, 8], strides = [1, 1]} : vector<8x96xf32> to vector<8x8xf32>
    %12 = vector.shape_cast %11 : vector<8x8xf32> to vector<1x8x8xf32>
    "tpu.trace_start"() <{level = 10 : i32, message = "bqd,bkd->bqk"}> : () -> ()
    %cst_6 = arith.constant dense<0.000000e+00> : vector<1x8x8xf32>
    %13 = tpu.matmul %8, %10, %cst_6 {dimension_numbers = #tpu.dot_dimension_numbers<[2], [2], [1], [1], [0, 0, 0, 1, 1, 1], [0], [0]>} : vector<1x8x8xf32>, vector<1x8x8xf32>, vector<1x8x8xf32> -> vector<1x8x8xf32>
    "tpu.trace_stop"() : () -> ()
    %cst_7 = arith.constant dense<0xFF800000> : vector<1x8xf32>
    %14 = vector.multi_reduction <maximumf>, %13, %cst_7 [2] : vector<1x8x8xf32> to vector<1x8xf32>
    %15 = vector.shape_cast %14 : vector<1x8xf32> to vector<1x8x1xf32>
    %16 = vector.broadcast %15 : vector<1x8x1xf32> to vector<1x8x8xf32>
    %17 = arith.subf %13, %16 : vector<1x8x8xf32>
    %18 = math.exp %17 : vector<1x8x8xf32>
    %cst_8 = arith.constant dense<0.000000e+00> : vector<1x8xf32>
    %19 = vector.multi_reduction <add>, %18, %cst_8 [2] : vector<1x8x8xf32> to vector<1x8xf32>
    %20 = vector.shape_cast %19 : vector<1x8xf32> to vector<1x8x1xf32>
    %21 = tpu.reciprocal %20 {approx = true} : vector<1x8x1xf32> -> vector<1x8x1xf32>
    %22 = arith.mulf %20, %21 : vector<1x8x1xf32>
    %cst_9 = arith.constant 2.000000e+00 : f32
    %23 = vector.broadcast %cst_9 : f32 to vector<1x8x1xf32>
    %24 = arith.subf %23, %22 : vector<1x8x1xf32>
    %25 = arith.mulf %21, %24 : vector<1x8x1xf32>
    %26 = vector.broadcast %25 : vector<1x8x1xf32> to vector<1x8x8xf32>
    %27 = arith.mulf %18, %26 : vector<1x8x8xf32>
    "tpu.trace_start"() <{level = 10 : i32, message = "bqk,bkd->bqd"}> : () -> ()
    %cst_10 = arith.constant dense<0.000000e+00> : vector<1x8x8xf32>
    %28 = tpu.matmul %27, %12, %cst_10 {dimension_numbers = #tpu.dot_dimension_numbers<[2], [1], [1], [2], [0, 0, 0, 1, 1, 2], [0], [0]>} : vector<1x8x8xf32>, vector<1x8x8xf32>, vector<1x8x8xf32> -> vector<1x8x8xf32>
    "tpu.trace_stop"() : () -> ()
    %29 = vector.extract_strided_slice %6 {offsets = [0, 8], sizes = [8, 8], strides = [1, 1]} : vector<8x96xf32> to vector<8x8xf32>
    %30 = vector.shape_cast %29 : vector<8x8xf32> to vector<1x8x8xf32>
    %31 = vector.extract_strided_slice %6 {offsets = [0, 40], sizes = [8, 8], strides = [1, 1]} : vector<8x96xf32> to vector<8x8xf32>
    %32 = vector.shape_cast %31 : vector<8x8xf32> to vector<1x8x8xf32>
    %33 = vector.extract_strided_slice %6 {offsets = [0, 72], sizes = [8, 8], strides = [1, 1]} : vector<8x96xf32> to vector<8x8xf32>
    %34 = vector.shape_cast %33 : vector<8x8xf32> to vector<1x8x8xf32>
    "tpu.trace_start"() <{level = 10 : i32, message = "bqd,bkd->bqk"}> : () -> ()
    %cst_11 = arith.constant dense<0.000000e+00> : vector<1x8x8xf32>
    %35 = tpu.matmul %30, %32, %cst_11 {dimension_numbers = #tpu.dot_dimension_numbers<[2], [2], [1], [1], [0, 0, 0, 1, 1, 1], [0], [0]>} : vector<1x8x8xf32>, vector<1x8x8xf32>, vector<1x8x8xf32> -> vector<1x8x8xf32>
    "tpu.trace_stop"() : () -> ()
    %cst_12 = arith.constant dense<0xFF800000> : vector<1x8xf32>
    %36 = vector.multi_reduction <maximumf>, %35, %cst_12 [2] : vector<1x8x8xf32> to vector<1x8xf32>
    %37 = vector.shape_cast %36 : vector<1x8xf32> to vector<1x8x1xf32>
    %38 = vector.broadcast %37 : vector<1x8x1xf32> to vector<1x8x8xf32>
    %39 = arith.subf %35, %38 : vector<1x8x8xf32>
    %40 = math.exp %39 : vector<1x8x8xf32>
    %cst_13 = arith.constant dense<0.000000e+00> : vector<1x8xf32>
    %41 = vector.multi_reduction <add>, %40, %cst_13 [2] : vector<1x8x8xf32> to vector<1x8xf32>
    %42 = vector.shape_cast %41 : vector<1x8xf32> to vector<1x8x1xf32>
    %43 = tpu.reciprocal %42 {approx = true} : vector<1x8x1xf32> -> vector<1x8x1xf32>
    %44 = arith.mulf %42, %43 : vector<1x8x1xf32>
    %cst_14 = arith.constant 2.000000e+00 : f32
    %45 = vector.broadcast %cst_14 : f32 to vector<1x8x1xf32>
    %46 = arith.subf %45, %44 : vector<1x8x1xf32>
    %47 = arith.mulf %43, %46 : vector<1x8x1xf32>
    %48 = vector.broadcast %47 : vector<1x8x1xf32> to vector<1x8x8xf32>
    %49 = arith.mulf %40, %48 : vector<1x8x8xf32>
    "tpu.trace_start"() <{level = 10 : i32, message = "bqk,bkd->bqd"}> : () -> ()
    %cst_15 = arith.constant dense<0.000000e+00> : vector<1x8x8xf32>
    %50 = tpu.matmul %49, %34, %cst_15 {dimension_numbers = #tpu.dot_dimension_numbers<[2], [1], [1], [2], [0, 0, 0, 1, 1, 2], [0], [0]>} : vector<1x8x8xf32>, vector<1x8x8xf32>, vector<1x8x8xf32> -> vector<1x8x8xf32>
    "tpu.trace_stop"() : () -> ()
    %51 = vector.extract_strided_slice %6 {offsets = [0, 16], sizes = [8, 8], strides = [1, 1]} : vector<8x96xf32> to vector<8x8xf32>
    %52 = vector.shape_cast %51 : vector<8x8xf32> to vector<1x8x8xf32>
    %53 = vector.extract_strided_slice %6 {offsets = [0, 48], sizes = [8, 8], strides = [1, 1]} : vector<8x96xf32> to vector<8x8xf32>
    %54 = vector.shape_cast %53 : vector<8x8xf32> to vector<1x8x8xf32>
    %55 = vector.extract_strided_slice %6 {offsets = [0, 80], sizes = [8, 8], strides = [1, 1]} : vector<8x96xf32> to vector<8x8xf32>
    %56 = vector.shape_cast %55 : vector<8x8xf32> to vector<1x8x8xf32>
    "tpu.trace_start"() <{level = 10 : i32, message = "bqd,bkd->bqk"}> : () -> ()
    %cst_16 = arith.constant dense<0.000000e+00> : vector<1x8x8xf32>
    %57 = tpu.matmul %52, %54, %cst_16 {dimension_numbers = #tpu.dot_dimension_numbers<[2], [2], [1], [1], [0, 0, 0, 1, 1, 1], [0], [0]>} : vector<1x8x8xf32>, vector<1x8x8xf32>, vector<1x8x8xf32> -> vector<1x8x8xf32>
    "tpu.trace_stop"() : () -> ()
    %cst_17 = arith.constant dense<0xFF800000> : vector<1x8xf32>
    %58 = vector.multi_reduction <maximumf>, %57, %cst_17 [2] : vector<1x8x8xf32> to vector<1x8xf32>
    %59 = vector.shape_cast %58 : vector<1x8xf32> to vector<1x8x1xf32>
    %60 = vector.broadcast %59 : vector<1x8x1xf32> to vector<1x8x8xf32>
    %61 = arith.subf %57, %60 : vector<1x8x8xf32>
    %62 = math.exp %61 : vector<1x8x8xf32>
    %cst_18 = arith.constant dense<0.000000e+00> : vector<1x8xf32>
    %63 = vector.multi_reduction <add>, %62, %cst_18 [2] : vector<1x8x8xf32> to vector<1x8xf32>
    %64 = vector.shape_cast %63 : vector<1x8xf32> to vector<1x8x1xf32>
    %65 = tpu.reciprocal %64 {approx = true} : vector<1x8x1xf32> -> vector<1x8x1xf32>
    %66 = arith.mulf %64, %65 : vector<1x8x1xf32>
    %cst_19 = arith.constant 2.000000e+00 : f32
    %67 = vector.broadcast %cst_19 : f32 to vector<1x8x1xf32>
    %68 = arith.subf %67, %66 : vector<1x8x1xf32>
    %69 = arith.mulf %65, %68 : vector<1x8x1xf32>
    %70 = vector.broadcast %69 : vector<1x8x1xf32> to vector<1x8x8xf32>
    %71 = arith.mulf %62, %70 : vector<1x8x8xf32>
    "tpu.trace_start"() <{level = 10 : i32, message = "bqk,bkd->bqd"}> : () -> ()
    %cst_20 = arith.constant dense<0.000000e+00> : vector<1x8x8xf32>
    %72 = tpu.matmul %71, %56, %cst_20 {dimension_numbers = #tpu.dot_dimension_numbers<[2], [1], [1], [2], [0, 0, 0, 1, 1, 2], [0], [0]>} : vector<1x8x8xf32>, vector<1x8x8xf32>, vector<1x8x8xf32> -> vector<1x8x8xf32>
    "tpu.trace_stop"() : () -> ()
    %73 = vector.extract_strided_slice %6 {offsets = [0, 24], sizes = [8, 8], strides = [1, 1]} : vector<8x96xf32> to vector<8x8xf32>
    %74 = vector.shape_cast %73 : vector<8x8xf32> to vector<1x8x8xf32>
    %75 = vector.extract_strided_slice %6 {offsets = [0, 56], sizes = [8, 8], strides = [1, 1]} : vector<8x96xf32> to vector<8x8xf32>
    %76 = vector.shape_cast %75 : vector<8x8xf32> to vector<1x8x8xf32>
    %77 = vector.extract_strided_slice %6 {offsets = [0, 88], sizes = [8, 8], strides = [1, 1]} : vector<8x96xf32> to vector<8x8xf32>
    %78 = vector.shape_cast %77 : vector<8x8xf32> to vector<1x8x8xf32>
    "tpu.trace_start"() <{level = 10 : i32, message = "bqd,bkd->bqk"}> : () -> ()
    %cst_21 = arith.constant dense<0.000000e+00> : vector<1x8x8xf32>
    %79 = tpu.matmul %74, %76, %cst_21 {dimension_numbers = #tpu.dot_dimension_numbers<[2], [2], [1], [1], [0, 0, 0, 1, 1, 1], [0], [0]>} : vector<1x8x8xf32>, vector<1x8x8xf32>, vector<1x8x8xf32> -> vector<1x8x8xf32>
    "tpu.trace_stop"() : () -> ()
    %cst_22 = arith.constant dense<0xFF800000> : vector<1x8xf32>
    %80 = vector.multi_reduction <maximumf>, %79, %cst_22 [2] : vector<1x8x8xf32> to vector<1x8xf32>
    %81 = vector.shape_cast %80 : vector<1x8xf32> to vector<1x8x1xf32>
    %82 = vector.broadcast %81 : vector<1x8x1xf32> to vector<1x8x8xf32>
    %83 = arith.subf %79, %82 : vector<1x8x8xf32>
    %84 = math.exp %83 : vector<1x8x8xf32>
    %cst_23 = arith.constant dense<0.000000e+00> : vector<1x8xf32>
    %85 = vector.multi_reduction <add>, %84, %cst_23 [2] : vector<1x8x8xf32> to vector<1x8xf32>
    %86 = vector.shape_cast %85 : vector<1x8xf32> to vector<1x8x1xf32>
    %87 = tpu.reciprocal %86 {approx = true} : vector<1x8x1xf32> -> vector<1x8x1xf32>
    %88 = arith.mulf %86, %87 : vector<1x8x1xf32>
    %cst_24 = arith.constant 2.000000e+00 : f32
    %89 = vector.broadcast %cst_24 : f32 to vector<1x8x1xf32>
    %90 = arith.subf %89, %88 : vector<1x8x1xf32>
    %91 = arith.mulf %87, %90 : vector<1x8x1xf32>
    %92 = vector.broadcast %91 : vector<1x8x1xf32> to vector<1x8x8xf32>
    %93 = arith.mulf %84, %92 : vector<1x8x8xf32>
    "tpu.trace_start"() <{level = 10 : i32, message = "bqk,bkd->bqd"}> : () -> ()
    %cst_25 = arith.constant dense<0.000000e+00> : vector<1x8x8xf32>
    %94 = tpu.matmul %93, %78, %cst_25 {dimension_numbers = #tpu.dot_dimension_numbers<[2], [1], [1], [2], [0, 0, 0, 1, 1, 2], [0], [0]>} : vector<1x8x8xf32>, vector<1x8x8xf32>, vector<1x8x8xf32> -> vector<1x8x8xf32>
    "tpu.trace_stop"() : () -> ()
    %95 = tpu.concatenate %28, %50, %72, %94 in 2 : vector<1x8x8xf32>, vector<1x8x8xf32>, vector<1x8x8xf32>, vector<1x8x8xf32> -> vector<1x8x32xf32>
    %96 = vector.shape_cast %95 : vector<1x8x32xf32> to vector<8x32xf32>
    %c0_26 = arith.constant 0 : index
    %c0_27 = arith.constant 0 : index
    %97 = vector.load %arg4[%c0_26, %c0_27] : memref<32x32xf32, #tpu.memory_space<vmem>>, vector<32x32xf32>
    %cst_28 = arith.constant dense<0.000000e+00> : vector<8x32xf32>
    %98 = tpu.matmul %96, %97, %cst_28 {dimension_numbers = #tpu.dot_dimension_numbers<[1], [0], [0], [1], [0, 0, 1, 1], [], []>} : vector<8x32xf32>, vector<32x32xf32>, vector<8x32xf32> -> vector<8x32xf32>
    %c0_29 = arith.constant 0 : index
    %c0_30 = arith.constant 0 : index
    %99 = vector.load %arg5[%c0_29, %c0_30] : memref<1x32xf32, #tpu.memory_space<vmem>>, vector<1x32xf32>
    %100 = vector.broadcast %99 : vector<1x32xf32> to vector<8x32xf32>
    %101 = arith.addf %98, %100 : vector<8x32xf32>
    %102 = vector.shape_cast %101 : vector<8x32xf32> to vector<1x8x32xf32>
    %c0_31 = arith.constant 0 : index
    %c0_32 = arith.constant 0 : index
    %c0_33 = arith.constant 0 : index
    %103 = vector.load %arg6[%c0_31, %c0_32, %c0_33] : memref<1x8x32xf32, #tpu.memory_space<vmem>>, vector<1x8x32xf32>
    tpu.vector_store %arg6[%c0_31, %c0_32, %c0_33], %102 {strides = array<i32>} : memref<1x8x32xf32, #tpu.memory_space<vmem>>, vector<1x8x32xf32>,
    return
  }
  func.func @transform_0(%arg0: i32) -> (i32, i32, i32) {
    %c0_i32 = arith.constant 0 : i32
    %c0_i32_0 = arith.constant 0 : i32
    %c0_i32_1 = arith.constant 0 : i32
    return %arg0, %c0_i32, %c0_i32_0 : i32, i32, i32
  }
  func.func @transform_1(%arg0: i32) -> (i32, i32) {
    %c0_i32 = arith.constant 0 : i32
    %c0_i32_0 = arith.constant 0 : i32
    %c0_i32_1 = arith.constant 0 : i32
    return %c0_i32, %c0_i32_0 : i32, i32
  }
  func.func @transform_2(%arg0: i32) -> (i32, i32) {
    %c0_i32 = arith.constant 0 : i32
    %c0_i32_0 = arith.constant 0 : i32
    %c0_i32_1 = arith.constant 0 : i32
    return %c0_i32, %c0_i32_0 : i32, i32
  }
  func.func @transform_3(%arg0: i32) -> (i32, i32) {
    %c0_i32 = arith.constant 0 : i32
    %c0_i32_0 = arith.constant 0 : i32
    %c0_i32_1 = arith.constant 0 : i32
    return %c0_i32, %c0_i32_0 : i32, i32
  }
  func.func @transform_4(%arg0: i32) -> (i32, i32) {
    %c0_i32 = arith.constant 0 : i32
    %c0_i32_0 = arith.constant 0 : i32
    %c0_i32_1 = arith.constant 0 : i32
    return %c0_i32, %c0_i32_0 : i32, i32
  }
  func.func @transform_5(%arg0: i32) -> (i32, i32, i32) {
    %c0_i32 = arith.constant 0 : i32
    %c0_i32_0 = arith.constant 0 : i32
    %c0_i32_1 = arith.constant 0 : i32
    return %arg0, %c0_i32, %c0_i32_0 : i32, i32, i32
  }
}

</mosaic_0001>

<bundles_post_ra>
// kernel: tpu_custom_call.1
= control target key start
LH: loop header
LB: loop body
LE: loop exit
PB: predicated region body
PF: predicated region fallthrough
CT: control target
= control target key end

     0   :  { %10 = vsyncpa [#allocation3], 0  ;;  %s1989_s0 = inlined_call_operand.hbm [shape: f32[2,8,32], index: 0, kind: input, shape index: {}]   ;;  %s1990_s1 = inlined_call_operand.hbm [shape: f32[32,96], index: 1, kind: input, shape index: {}]   ;;  %s1991_s2 = inlined_call_operand.vmem [shape: f32[1,96], index: 2, kind: input, shape index: {}]   ;;  %s1992_s3 = inlined_call_operand.hbm [shape: f32[32,32], index: 3, kind: input, shape index: {}]   ;;  %s1993_s4 = inlined_call_operand.vmem [shape: f32[1,32], index: 4, kind: input, shape index: {}]   ;;  %s1994_s5 = inlined_call_operand.hbm [shape: f32[2,8,32], index: 5, kind: output, shape index: {}]  }
   0x1   :  { %12 = vsyncpa [#allocation3 + $0x1], 0 }
   0x2   :  { %13 = vsyncpa [#allocation6], 0 }
   0x3   :  { %14 = vsyncpa [#allocation4], 0 }
   0x4   :  { %16 = vsyncpa [#allocation4 + $0x1], 0  ;;  %s1677_s18 = smov 0   ;;  %s1679_s19 = smov 0  }
   0x5   :  { %s1681_s20 = smov 0   ;;  %s1683_s21 = smov 0  }
   0x6 LB: > { %s1698_s22 = sadd.s32 4294967295, %s1622_s21   ;;  %s1232_s23 = sadd.s32 4294967294, %s1622_s21   ;;  %s1622_s21 = sphi %s1683_s21, %s2014_s21   ;;  %s1618_s20 = sphi %s1681_s20, %s2013_s20   ;;  %s1614_s19 = sphi %s1679_s19, %s2012_s19   ;;  %s1610_s18 = sphi %s1677_s18, %s2011_s18  }
   0x7   : > { %p42_p0 = scmp.ne.s32.totalorder %s1614_s19, %s1610_s18  ;;  %p1995_p1 = scmp.eq.s32.totalorder %s1698_s22, 0 }
   0x8   : > { %p156_p3 = scmp.eq.s32.totalorder %s1232_s23, 1  ;;  %p1233_p5 = scmp.ge.s32.totalorder %s1622_s21, 1 }
   0x9   : > { %p1707_p4 = por %p1995_p1, %p42_p0  ;;  %p163_p7 = scmp.lt.s32.totalorder %s1622_s21, 3 }
   0xa   : > { %p1712_p6 = por %p156_p3, %p42_p0  ;;  %s1624_s27 = smov [#allocation5]  }
   0xb   : > { %s1998_s24 = scalar_select %p1707_p4, 1, 0 }
   0xc   : > { %s1999_s25 = scalar_select %p1712_p6, 1, 0 }
   0xd   : > { %p1717_p8 = pnand %p1233_p5, %p163_p7  ;;  %s175_s28 = sshll.u32 %s1624_s27, 4  ;;  %s1721_s28 = int_to_ptr.vmem [resolvable:$true] %s175_s28 }
   0xe   : > { %s1625_s30 = smov [#allocation7]   ;;  %s1466_s9 = scalar_lea.hbm %s1990_s1, 512 }
   0xf   : > { %p1376_p9 = pneg %p1717_p8  ;;  %s191_s6 = sshll.u32 %s1625_s30, 4  ;;  %s1732_s6 = int_to_ptr.vmem [resolvable:$true] %s191_s6 }
  0x10   : > { %p1467_p12 = scmp.ne.s32.totalorder %s1990_s1, %s1466_s9  ;;  %p1473_p5 = scmp.lt.u32.totalorder %s1466_s9, %s1990_s1 }
  0x11   : > { %p1728_p11 = pnand %p1376_p9, %p1995_p1 }
  0x13   : > { %p1468_p13 = pneg %p1728_p11 }
  0x15   : > { %p1469_p0 = pnand %p1468_p13, %p1467_p12 }
  0x17   : > { %p1470_p3 = pneg %p1469_p0 }
  0x19   : > { %p1475_p7 = pnand %p1473_p5, %p1470_p3 }
  0x1b   : > { %1478 = shalt.err (!%p1475_p7)
}
  0x1c   : > { %s1479_s14 = scalar_lea.vmem %s1721_s28, 512  ;;  %p1487_p2 = scmp.lt.s32.totalorder %s1721_s28, %s1721_s28 }
  0x1d   : > { %p1480_p9 = scmp.ne.s32.totalorder %s1721_s28, %s1479_s14  ;;  %p1488_p12 = scmp.lt.s32.totalorder %s1479_s14, %s1479_s14 }
  0x1f   : > { %p1482_p10 = pnand %p1480_p9, %p1468_p13  ;;  %p1489_p0 = por %p1488_p12, %p1487_p2 }
  0x21   : > { %p1483_p1 = pneg %p1482_p10 }
  0x23   : > { %p1490_p6 = pnand %p1489_p0, %p1483_p1 }
  0x25   : > { %1493 = shalt.err (!%p1490_p6)
}
  0x26   : > { %s1626_s15 = smov 128   ;;  %s1627_s16 = smov 8  }
  0x27   : > { %1379 = dma.hbm_to_vmem [thread:$0]  (!%p1728_p11), %s1990_s1, 512, %s1721_s28, [#allocation6], %s1626_s15, %s1626_s15, %s1627_s16  }
  0x28   : > { %s1494_s7 = scalar_lea.hbm %s1992_s3, 512 }
  0x29   : > { %p1495_p2 = scmp.ne.s32.totalorder %s1992_s3, %s1494_s7  ;;  %p1501_p10 = scmp.lt.u32.totalorder %s1494_s7, %s1992_s3 }
  0x2b   : > { %p1497_p1 = pnand %p1495_p2, %p1468_p13 }
  0x2d   : > { %p1498_p6 = pneg %p1497_p1 }
  0x2f   : > { %p1503_p3 = pnand %p1501_p10, %p1498_p6 }
  0x31   : > { %1506 = shalt.err (!%p1503_p3)
}
  0x32   : > { %s1507_s28 = scalar_lea.vmem %s1732_s6, 512  ;;  %p1515_p12 = scmp.lt.s32.totalorder %s1732_s6, %s1732_s6 }
  0x33   : > { %p1508_p5 = scmp.ne.s32.totalorder %s1732_s6, %s1507_s28  ;;  %p1516_p0 = scmp.lt.s32.totalorder %s1507_s28, %s1507_s28 }
  0x35   : > { %p1510_p7 = pnand %p1508_p5, %p1468_p13  ;;  %p1517_p2 = por %p1516_p0, %p1515_p12 }
  0x37   : > { %p1511_p9 = pneg %p1510_p7 }
  0x39   : > { %p1518_p1 = pnand %p1517_p2, %p1511_p9 }
  0x3b   : > { %1521 = shalt.err (!%p1518_p1)
}
  0x3c   : > { %1382 = dma.hbm_to_vmem [thread:$0]  (!%p1728_p11), %s1992_s3, 512, %s1732_s6, [#allocation6], %s1626_s15, %s1626_s15, %s1627_s16  }
  0x3d   : > { %s1787_s14 = sadd.s32 1, %s1622_s21   ;;  %s29_s29 = sadd.s32 1, %s1618_s20 }
  0x3e   : > { %s26_s17 = ssub.s32 %s1622_s21, %s1787_s14  ;;  %p36_p13 = scmp.ne.s32.totalorder %s1618_s20, %s1614_s19 }
  0x3f   : > { %p27_p6 = scmp.eq.s32.totalorder %s26_s17, 0  ;;  %p37_p10 = scmp.eq.s32.totalorder %s1622_s21, 0 }
  0x40   : > { %p2002_p3 = scmp.eq.s32.totalorder %s1698_s22, 1  ;;  %p1393_p7 = scmp.lt.s32.totalorder %s1622_s21, 2 }
  0x41   : > { %s1803_s27 = scalar_select %p27_p6, %s1618_s20, %s29_s29  }
  0x42   : > { %p1797_p5 = por %p2002_p3, %p36_p13  ;;  %p38_p9 = por %p37_p10, %p36_p13 }
  0x43   : > { %s208_s30 = sand.u32 1, %s1618_s20   ;;  %s1238_s6 = sshll.u32 %s1622_s21, 7 }
  0x44   : > { %s2003_s23 = scalar_select %p1797_p5, 1, 0 }
  0x45   : > { %s1237_s7 = sshll.u32 %s208_s30, 3  ;;  %s1810_s8 = scalar_lea.hbm %s1989_s0, %s1238_s6 }
  0x46   : > { %s212_s9 = scalar_lea.vmem [#allocation2], %s1237_s7  ;;  %p1814_p11 = pnand %p1393_p7, %p38_p9 }
  0x47   : > { %s219_s10 = sshll.u32 %s212_s9, 4  ;;  %s209_s28 = scalar_lea.sflag [#allocation3], %s208_s30  ;;  %s1812_s10 = int_to_ptr.vmem [resolvable:$true] %s219_s10 }
  0x48   : > { %s1522_s12 = scalar_lea.hbm %s1810_s8, 128  ;;  %p1524_p0 = pneg %p1814_p11 }
  0x49   : > { %p1523_p12 = scmp.ne.s32.totalorder %s1810_s8, %s1522_s12  ;;  %s1527_s17 = scalar_lea.hbm %s1989_s0, 256 }
  0x4a   : > { %p1528_p13 = scmp.lt.u32.totalorder %s1810_s8, %s1989_s0  ;;  %p1529_p6 = scmp.lt.u32.totalorder %s1527_s17, %s1522_s12 }
  0x4b   : > { %p1525_p2 = pnand %p1524_p0, %p1523_p12  ;;  %p1531_p3 = scmp.lt.u32.totalorder %s1522_s12, %s1810_s8 }
  0x4c   : > { %p1530_p10 = por %p1529_p6, %p1528_p13 }
  0x4d   : > { %p1526_p1 = pneg %p1525_p2 }
  0x4e   : > { %p1532_p7 = por %p1531_p3, %p1530_p10 }
  0x50   : > { %p1533_p9 = pnand %p1532_p7, %p1526_p1 }
  0x52   : > { %1536 = shalt.err (!%p1533_p9)
}
  0x53   : > { %s1537_s30 = scalar_lea.vmem %s1812_s10, 128  ;;  %s1628_s15 = smov [#allocation2]  }
  0x54   : > { %p1538_p12 = scmp.ne.s32.totalorder %s1812_s10, %s1537_s30  ;;  %s1542_s16 = sshll.u32 %s1628_s15, 4  ;;  %s1543_s16 = int_to_ptr.vmem [resolvable:$false] %s1542_s16 }
  0x55   : > { %s1544_s9 = scalar_lea.vmem %s1543_s16, 256  ;;  %p1545_p4 = scmp.lt.s32.totalorder %s1812_s10, %s1543_s16 }
  0x56   : > { %p1540_p2 = pnand %p1538_p12, %p1524_p0  ;;  %p1546_p13 = scmp.lt.s32.totalorder %s1544_s9, %s1537_s30 }
  0x58   : > { %p1541_p5 = pneg %p1540_p2  ;;  %p1547_p6 = por %p1546_p13, %p1545_p4 }
  0x5a   : > { %p1548_p10 = pnand %p1547_p6, %p1541_p5 }
  0x5c   : > { %1551 = shalt.err (!%p1548_p10)
}
  0x5d   : > { %1386 = dma.hbm_to_vmem [thread:$0]  (!%p1814_p11), %s1810_s8, 128, %s1812_s10, %s209_s28  }
  0x5e   : > { %228 = sbr.rel (%p1717_p8) target bundleno = 2079 (0x81f), region = 40  ;;  %s1846_s12 = sand.u32 (!%p1717_p8), 1, %s1614_s19  }
  0x5f   : > { %s1240_s13 = sshll.u32 (!%p1717_p8), %s1846_s12, 3  ;;  %s231_s29 = scalar_lea.sflag (!%p1717_p8), [#allocation3], %s1846_s12 }
  0x60   : > { %s234_s17 = scalar_lea.vmem (!%p1717_p8), [#allocation2], %s1240_s13  ;;  %p2005_p4 = scmp.ne.s32.totalorder (!%p1717_p8), %s1998_s24, 0 }
  0x65   : > { %1597 = dma.done.wait (%p2005_p4), %s231_s29, 128  }
  0x66   : > { %1599 = vsyncadd (%p2005_p4), %s231_s29, 4294967168  ;;  %p2006_p5 = scmp.eq.s32.totalorder %s1698_s22, 0 }
  0x68   : > { %1601 = dma.done.wait (%p2006_p5), [#allocation6], 1024   ;;  %p2007_p8 = pmov %p2006_p5 }
  0x69   : > { %v1629_v0 = vmov 0.0|0.0   ;;  %vm1630_vm0 = vmmov 0   ;;  %v1631_v1 = vmov 0.0   ;;  %v270_v2 = vld [vmem:[#allocation5] sm:$0xff]  ;;  %v271_v3 = vld [vmem:[#allocation5 + $0x8] sm:$0xff]  ;;  %v272_v4 = vld [vmem:[#allocation5 + $0x10] sm:$0xff] }
  0x6a   : > { %1603 = vsyncadd (%p2007_p8), [#allocation6], 4294966272  ;;  %1352 = vmatprep.subr.bf16.mxu0 %v1629_v0  ;;  %1298 = vmatprep.mubr.msk.f32.mxu0 %vm1630_vm0, %v1631_v1  ;;  %v1353_v5 = vpack.c.bf16 %v271_v3, %v270_v2  ;;  %v273_v6 = vld [vmem:[#allocation5 + $0x18] sm:$0xff]  ;;  %vm281_vm1 = vcmask 261120   ;;  %v1244_v9 = vld [vmem:[%s1991_s2] ss:$0 sm:$0xff] }
  0x6b   : > { %1301 = vmatprep.subr.mxu1 %v1631_v1  ;;  %1303 = vmatprep.mubr.msk.f32.mxu1 %vm1630_vm0, %v1631_v1  ;;  %v1356_v7 = vpack.c.bf16 %v273_v6, %v272_v4  ;;  %v269_v8 = vld [vmem:[%s234_s17] sm:$0xff]  ;;  %s1632_s8 = smov 64   ;;  %s1633_s10 = smov 96   ;;  %vm358_vm2 = vcmask 64512   ;;  %vm1040_vm3 = vcmask 130048   ;;  %vm1042_vm4 = vcmask 195584  }
  0x6c   : > { %1354 = vmatpush3.bf16.msra.mxu0 %v1353_v5  ;;  %s1634_s11 = smov 88   ;;  %s1635_s28 = smov 72  }
  0x6d   : > { %1355 = vmatprep.subr.bf16.mxu0 %v1629_v0  ;;  %s1636_s7 = smov 120   ;;  %s1637_s6 = smov 80  }
  0x6e   : > { %s1638_s30 = smov 112   ;;  %s1639_s15 = smov 104  }
  0x6f   : > { %s1640_s16 = smov 56   ;;  %s1641_s9 = smov 40  }
  0x70   : > { %1357 = vmatpush3.bf16.msra.mxu0 %v1356_v7  ;;  %s1642_s29 = smov 48   ;;  %s1643_s17 = smov 8  }
  0x71   : > { %1321 = vmatprep.subr.mxu0 %v1631_v1  ;;  %s1644_s24 = smov 16   ;;  %s1645_s26 = smov 24  }
  0x72   : > { %p2008_p0 = scmp.ne.s32.totalorder %s2003_s23, 0 }
  0x73   : > { %1299 = vmatmul.mubr.msk.f32.vlgmr.msra.gmra.mrb[0].mxu0 %vm281_vm1, %v269_v8 }
  0x74   : > { %1323 = vmatprep.mubr.msk.f32.mxu0 %vm1630_vm0, %v1631_v1 }
 0x146   : > { %v351_v10 = vpop.f32.mrb[0].mxu0 }
 0x147   : > { %v1874_v11 = vadd.f32 %v1244_v9, %v351_v10  ;;  %v1300_v12 = vpop.f32.mrb[1].mxu0 }
 0x149   : > { %447 = vrot.lane.b32.xlu1 %v1874_v11, %s1632_s8  ;;  %356 = vrot.lane.b32.xlu0 %v1874_v11, %s1633_s10 }
 0x14d   : > { %525 = vrot.lane.b32.xlu1 %v1874_v11, %s1634_s11  ;;  %s1261_s11 = sshll.u32 %s1698_s22, 7 }
 0x1bb   : > { %v357_v13 = vpop.permute.xlu0 %356  ;;  %v448_v14 = vpop.permute.xlu1 %447 }
 0x1bc   : > { %1302 = vmatpush3.xpose.msk.msra.mxu1 %vm358_vm2, %v357_v13 }
 0x1bd   : > { %1306 = vmatprep.subr.mxu1 %v1631_v1 }
 0x1bf   : > { %1304 = vmatmul.mubr.msk.f32.vlgmr.msra.gmra.mrb[0].mxu1 %vm358_vm2, %v1874_v11  ;;  %v526_v23 = vpop.permute.xlu1 %525 }
 0x1c0   : > { %1307 = vmatpush3.msra.mxu1 %v448_v14  ;;  %1308 = vmatprep.mubr.msk.f32.mxu1 %vm1630_vm0, %v1631_v1 }
 0x1c1   : > { %1311 = vmatprep.subr.mxu1 %v1631_v1 }
 0x292   : > { %v429_v15 = vpop.f32.mrb[0].mxu1 }
 0x293   : > { %v1305_v16 = vpop.f32.mrb[1].mxu1  ;;  %v433_v17 = vsel %vm358_vm2, %v429_v15, -inf }
 0x294   : > { %434 = vmax.xlane.f32.xlu0 %v433_v17 }
 0x2aa   : > { %861 = vrot.lane.b32.xlu0 %v1874_v11, %s1635_s28  ;;  %s268_s28 = scalar_lea.vmem [#allocation8], %s1240_s13  ;;  %s1646_s13 = smov [#allocation8]  }
 0x321   : > { %v435_v18 = vpop.xlane.xlu0 %434 }
 0x322   : > { %v436_v19 = vsub.f32 %v429_v15, %v435_v18 }
 0x324   : > { %v437_v20 = vmul.f32 1.442695, %v436_v19 }
 0x325   : > { %v862_v30 = vpop.permute.xlu0 %861 }
 0x326   : > { %1450 = vpow2.f32 %v437_v20  ;;  %v1044_v20 = vld [vmem:[#allocation7] sm:$0xff] }
 0x330   : > { %v1451_v21 = vpop.eup %1450 }
 0x331   : > { %v439_v22 = vsel %vm358_vm2, %v1451_v21, 0.0 }
 0x332   : > { %440 = vadd.xlane.f32.xlu1 %v439_v22 }
 0x343   : > { %523 = vrot.lane.b32.xlu1 %v1874_v11, %s1636_s7  ;;  %s1143_s7 = sshll.u32 %s268_s28, 4  ;;  %s1946_s7 = int_to_ptr.vmem [resolvable:$true] %s1143_s7 }
 0x344   : > { %s1552_s22 = scalar_lea.vmem %s1946_s7, 128 }
 0x345   : > { %p1553_p11 = scmp.ne.s32.totalorder %s1946_s7, %s1552_s22 }
 0x347   : > { %693 = vrot.lane.b32.xlu1 %v1874_v11, %s1637_s6  ;;  %p1554_p1 = pnand %p1553_p11, %p2008_p0 }
 0x349   : > { %p1555_p3 = pneg %p1554_p1 }
 0x34b   : > { %691 = vrot.lane.b32.xlu1 %v1874_v11, %s1638_s30 }
 0x34f   : > { %859 = vrot.lane.b32.xlu1 %v1874_v11, %s1639_s15  ;;  %s1944_s15 = scalar_lea.hbm %s1994_s5, %s1261_s11 }
 0x3bf   : > { %v441_v24 = vpop.xlane.xlu1 %440 }
 0x3c0   : > { %1452 = vrcp.f32 %v441_v24 }
 0x3c3   : > { %v524_v25 = vpop.permute.xlu1 %523 }
 0x3c7   : > { %v694_v26 = vpop.permute.xlu1 %693 }
 0x3c8   : > { %1322 = vmatpush3.xpose.msk.msra.mxu0 %vm358_vm2, %v694_v26 }
 0x3c9   : > { %1331 = vmatprep.subr.mxu0 %v1631_v1 }
 0x3ca   : > { %v1453_v27 = vpop.eup %1452 }
 0x3cb   : > { %v443_v28 = vmul.f32 %v1453_v27, %v441_v24  ;;  %v692_v29 = vpop.permute.xlu1 %691  ;;  %v1047_v24 = vld [vmem:[#allocation7 + $0x18] sm:$0xff] }
 0x3cc   : > { %1324 = vmatmul.mubr.msk.f32.vlgmr.msra.gmra.mrb[2].mxu0 %vm358_vm2, %v692_v29 }
 0x3cd   : > { %v444_v31 = vsub.f32 2.0, %v443_v28  ;;  %1332 = vmatpush3.xpose.msk.msra.mxu0 %vm358_vm2, %v862_v30  ;;  %1333 = vmatprep.mubr.msk.f32.mxu0 %vm1630_vm0, %v1631_v1 }
 0x3ce   : > { %1358 = vmatprep.subr.bf16.mxu0 %v1629_v0 }
 0x3cf   : > { %v445_v32 = vmul.f32 %v1453_v27, %v444_v31  ;;  %v860_v33 = vpop.permute.xlu1 %859 }
 0x3d0   : > { %1334 = vmatmul.mubr.msk.f32.vlgmr.msra.gmra.mrb[4].mxu0 %vm358_vm2, %v860_v33 }
 0x3d1   : > { %v446_v34 = vmul.f32 %v1451_v21, %v445_v32  ;;  %1349 = vmatprep.mubr.msk.f32.mxu0 %vm1630_vm0, %v1631_v1  ;;  %v1045_v21 = vld [vmem:[#allocation7 + $0x8] sm:$0xff] }
 0x3d2   : > { %v1359_v22 = vpack.c.bf16 %v1045_v21, %v1044_v20 }
 0x3d3   : > { %1309 = vmatmul.mubr.msk.f32.vlgmr.msra.gmra.mrb[2].mxu1 %vm358_vm2, %v446_v34 }
 0x3d4   : > { %1312 = vmatpush3.xpose.msk.msra.mxu1 %vm358_vm2, %v526_v23  ;;  %1313 = vmatprep.mubr.msk.f32.mxu1 %vm1630_vm0, %v1631_v1  ;;  %v1046_v23 = vld [vmem:[#allocation7 + $0x10] sm:$0xff] }
 0x3d5   : > { %1316 = vmatprep.subr.mxu1 %v1631_v1  ;;  %1360 = vmatpush3.bf16.msra.mxu0 %v1359_v22 }
 0x3d6   : > { %1361 = vmatprep.subr.bf16.mxu0 %v1629_v0 }
 0x3d7   : > { %1314 = vmatmul.mubr.msk.f32.vlgmr.msra.gmra.mrb[4].mxu1 %vm358_vm2, %v524_v25  ;;  %v1362_v25 = vpack.c.bf16 %v1047_v24, %v1046_v23 }
 0x3d8   : > { %1318 = vmatprep.mubr.msk.f32.mxu1 %vm1630_vm0, %v1631_v1 }
 0x3d9   : > { %1363 = vmatpush3.bf16.msra.mxu0 %v1362_v25 }
 0x49f   : > { %v765_v35 = vpop.f32.mrb[2].mxu0 }
 0x4a0   : > { %v1325_v36 = vpop.f32.mrb[3].mxu0  ;;  %v769_v37 = vsel %vm358_vm2, %v765_v35, -inf }
 0x4a1   : > { %770 = vmax.xlane.f32.xlu0 %v769_v37  ;;  %v1258_v36 = vld [vmem:[%s1993_s4] ss:$0 sm:$0xff] }
 0x4a3   : > { %v933_v38 = vpop.f32.mrb[4].mxu0 }
 0x4a4   : > { %v1335_v39 = vpop.f32.mrb[5].mxu0  ;;  %v937_v45 = vsel %vm358_vm2, %v933_v38, -inf }
 0x4a6   : > { %v1912_v40 = vpop.f32.mrb[2].mxu1 }
 0x4a7   : > { %v1310_v41 = vpop.f32.mrb[3].mxu1 }
 0x4aa   : > { %v597_v42 = vpop.f32.mrb[4].mxu1 }
 0x4ab   : > { %v1315_v43 = vpop.f32.mrb[5].mxu1  ;;  %v601_v44 = vsel %vm358_vm2, %v597_v42, -inf }
 0x4ac   : > { %602 = vmax.xlane.f32.xlu1 %v601_v44 }
 0x4b0   : > { %938 = vmax.xlane.f32.xlu1 %v937_v45 }
 0x52e   : > { %v771_v46 = vpop.xlane.xlu0 %770 }
 0x52f   : > { %v772_v47 = vsub.f32 %v765_v35, %v771_v46 }
 0x531   : > { %v773_v48 = vmul.f32 1.442695, %v772_v47 }
 0x533   : > { %1454 = vpow2.f32 %v773_v48 }
 0x539   : > { %v603_v49 = vpop.xlane.xlu1 %602 }
 0x53a   : > { %v604_v50 = vsub.f32 %v597_v42, %v603_v49 }
 0x53c   : > { %v605_v51 = vmul.f32 1.442695, %v604_v50 }
 0x53d   : > { %v1455_v52 = vpop.eup %1454  ;;  %v939_v53 = vpop.xlane.xlu1 %938 }
 0x53e   : > { %1456 = vpow2.f32 %v605_v51  ;;  %v940_v54 = vsub.f32 %v933_v38, %v939_v53  ;;  %v775_v55 = vsel %vm358_vm2, %v1455_v52, 0.0 }
 0x53f   : > { %776 = vadd.xlane.f32.xlu1 %v775_v55 }
 0x540   : > { %v941_v56 = vmul.f32 1.442695, %v940_v54 }
 0x542   : > { %1458 = vpow2.f32 %v941_v56 }
 0x548   : > { %v1457_v57 = vpop.eup %1456 }
 0x549   : > { %v607_v58 = vsel %vm358_vm2, %v1457_v57, 0.0 }
 0x54a   : > { %608 = vadd.xlane.f32.xlu1 %v607_v58 }
 0x54c   : > { %v1459_v59 = vpop.eup %1458 }
 0x54d   : > { %v943_v60 = vsel %vm358_vm2, %v1459_v59, 0.0 }
 0x54e   : > { %944 = vadd.xlane.f32.xlu0 %v943_v60 }
 0x55b   : > { %615 = vrot.lane.b32.xlu1 %v1874_v11, %s1640_s16  ;;  %s1130_s16 = scalar_lea.sflag [#allocation4], %s1846_s12 }
 0x55f   : > { %951 = vrot.lane.b32.xlu1 %v1874_v11, %s1641_s9  ;;  %s1556_s9 = sshll.u32 %s1646_s13, 4  ;;  %s1557_s9 = int_to_ptr.vmem [resolvable:$false] %s1556_s9 }
 0x560   : > { %p1559_p7 = scmp.lt.s32.totalorder %s1946_s7, %s1557_s9 }
 0x564   : > { %783 = vrot.lane.b32.xlu0 %v1874_v11, %s1642_s29  ;;  %s1558_s29 = scalar_lea.vmem %s1557_s9, 256 }
 0x565   : > { %p1560_p9 = scmp.lt.s32.totalorder %s1558_s29, %s1552_s22 }
 0x567   : > { %p1561_p12 = por %p1560_p9, %p1559_p7 }
 0x569   : > { %p1562_p2 = pnand %p1561_p12, %p1555_p3 }
 0x5cc   : > { %v777_v61 = vpop.xlane.xlu1 %776 }
 0x5cd   : > { %1460 = vrcp.f32 %v777_v61 }
 0x5d7   : > { %v609_v62 = vpop.xlane.xlu1 %608  ;;  %v1461_v3 = vpop.eup %1460 }
 0x5d8   : > { %1462 = vrcp.f32 %v609_v62  ;;  %v779_v4 = vmul.f32 %v1461_v3, %v777_v61 }
 0x5da   : > { %v780_v7 = vsub.f32 2.0, %v779_v4 }
 0x5db   : > { %v945_v63 = vpop.xlane.xlu0 %944  ;;  %v616_v2 = vpop.permute.xlu1 %615 }
 0x5dc   : > { %1464 = vrcp.f32 %v945_v63  ;;  %1317 = vmatpush3.msra.mxu1 %v616_v2  ;;  %v781_v11 = vmul.f32 %v1461_v3, %v780_v7 }
 0x5dd   : > { %1326 = vmatprep.subr.mxu1 %v1631_v1 }
 0x5de   : > { %v782_v16 = vmul.f32 %v1455_v52, %v781_v11 }
 0x5df   : > { %v784_v15 = vpop.permute.xlu0 %783  ;;  %v952_v18 = vpop.permute.xlu1 %951 }
 0x5e2   : > { %v1463_v5 = vpop.eup %1462 }
 0x5e3   : > { %v611_v6 = vmul.f32 %v1463_v5, %v609_v62 }
 0x5e5   : > { %v612_v8 = vsub.f32 2.0, %v611_v6 }
 0x5e6   : > { %v1465_v9 = vpop.eup %1464 }
 0x5e7   : > { %v613_v10 = vmul.f32 %v1463_v5, %v612_v8  ;;  %v947_v12 = vmul.f32 %v1465_v9, %v945_v63 }
 0x5e9   : > { %v614_v13 = vmul.f32 %v1457_v57, %v613_v10  ;;  %v948_v14 = vsub.f32 2.0, %v947_v12 }
 0x5eb   : > { %1319 = vmatmul.mubr.msk.f32.vlgmr.msra.gmra.mrb[6].mxu1 %vm358_vm2, %v614_v13  ;;  %v949_v17 = vmul.f32 %v1465_v9, %v948_v14 }
 0x5ec   : > { %1327 = vmatpush3.msra.mxu1 %v784_v15  ;;  %1328 = vmatprep.mubr.msk.f32.mxu1 %vm1630_vm0, %v1631_v1 }
 0x5ed   : > { %1336 = vmatprep.subr.mxu1 %v1631_v1  ;;  %v950_v19 = vmul.f32 %v1459_v59, %v949_v17 }
 0x5ef   : > { %1329 = vmatmul.mubr.msk.f32.vlgmr.msra.gmra.mrb[8].mxu1 %vm358_vm2, %v782_v16 }
 0x5f0   : > { %1337 = vmatpush3.msra.mxu1 %v952_v18  ;;  %1338 = vmatprep.mubr.msk.f32.mxu1 %vm1630_vm0, %v1631_v1 }
 0x5f3   : > { %1339 = vmatmul.mubr.msk.f32.vlgmr.msra.gmra.mrb[10].mxu1 %vm358_vm2, %v950_v19 }
 0x6be   : > { %v687_v26 = vpop.f32.mrb[6].mxu1 }
 0x6bf   : > { %1028 = vrot.lane.b32.xlu1 %v687_v26, %s1643_s17  ;;  %v1320_v27 = vpop.f32.mrb[7].mxu1 }
 0x6c2   : > { %v855_v28 = vpop.f32.mrb[8].mxu1 }
 0x6c3   : > { %1032 = vrot.lane.b32.xlu0 %v855_v28, %s1644_s24  ;;  %v1330_v1 = vpop.f32.mrb[9].mxu1 }
 0x6c6   : > { %v1023_v29 = vpop.f32.mrb[10].mxu1 }
 0x6c7   : > { %1036 = vrot.lane.b32.xlu1 %v1023_v29, %s1645_s26  ;;  %v1340_v30 = vpop.f32.mrb[11].mxu1 }
 0x731   : > { %v1029_v31 = vpop.permute.xlu1 %1028 }
 0x732   : > { %v1039_v32 = vsel %vm358_vm2, %v1912_v40, %v1029_v31 }
 0x735   : > { %v1033_v0 = vpop.permute.xlu0 %1032 }
 0x736   : > { %v1041_v33 = vsel %vm1040_vm3, %v1039_v32, %v1033_v0 }
 0x739   : > { %v1037_v34 = vpop.permute.xlu1 %1036 }
 0x73a   : > { %v1043_v35 = vsel %vm1042_vm4, %v1041_v33, %v1037_v34 }
 0x73b   : > { %1350 = vmatmul.mubr.msk.f32.vlgmr.msra.gmra.mrb[6].mxu0 %vm281_vm1, %v1043_v35 }
 0x80e   : > { %v1124_v37 = vpop.f32.mrb[6].mxu0 }
 0x80f   : > { %v1125_v38 = vadd.f32 %v1258_v36, %v1124_v37  ;;  %v1351_v39 = vpop.f32.mrb[7].mxu0 }
 0x811   : > { %1128 = vst.msk [vmem:[%s268_s28] sm:$0xff] %vm281_vm1, %v1125_v38 }
 0x812   : > { %1565 = shalt.err (!%p1562_p2)
}
 0x813   : > { %s1566_s12 = scalar_lea.hbm %s1944_s15, 128  ;;  %s1570_s26 = scalar_lea.hbm %s1994_s5, 256 }
 0x814   : > { %p1567_p13 = scmp.ne.s32.totalorder %s1944_s15, %s1566_s12  ;;  %p1571_p4 = scmp.lt.u32.totalorder %s1944_s15, %s1994_s5 }
 0x815   : > { %p1572_p5 = scmp.lt.u32.totalorder %s1570_s26, %s1566_s12  ;;  %p1574_p11 = scmp.lt.u32.totalorder %s1566_s12, %s1944_s15 }
 0x816   : > { %p1568_p6 = pnand %p1567_p13, %p2008_p0 }
 0x817   : > { %p1573_p8 = por %p1572_p5, %p1571_p4 }
 0x818   : > { %p1569_p10 = pneg %p1568_p6 }
 0x819   : > { %p1575_p1 = por %p1574_p11, %p1573_p8 }
 0x81b   : > { %p1576_p3 = pnand %p1575_p1, %p1569_p10 }
 0x81d   : > { %1579 = shalt.err (!%p1576_p3)
}
 0x81e   : > { %1374 = dma.vmem_to_hbm [thread:$0]  (%p2008_p0), %s1946_s7, 128, %s1944_s15, %s1130_s16  }
 0x81f PF: > { %s1155_s11 = sand.u32 1, %s1610_s18   ;;  %p2009_p7 = scmp.ne.s32.totalorder %s1999_s25, 0 }
 0x820   : > { %p2010_p9 = scmp.ge.s32.totalorder %s1622_s21, 2  ;;  %s1156_s28 = scalar_lea.sflag [#allocation4], %s1155_s11 }
 0x822   : > { %p1388_p12 = pnand %p2010_p9, %p2009_p7 }
 0x824   : > { %1605 = dma.done.wait (!%p1388_p12), %s1156_s28, 128  }
 0x825   : > { %1607 = vsyncadd (!%p1388_p12), %s1156_s28, 4294967168  ;;  %p19_p2 = scmp.ge.s32.totalorder %s1787_s14, 4   ;;  %s2011_s18 = smov %s1614_s19 }
 0x826   : > { %s2012_s19 = smov %s1618_s20  ;;  %s2013_s20 = smov %s1803_s27 }
 0x827   : > { %s2014_s21 = smov %s1787_s14  ;;  %21 = sbr.rel (!%p19_p2) target bundleno = 6 (0x6), region = 93 }
 0x82e   :  { %1161 = vsyncpa [#allocation3], 1 }
 0x82f   :  { %1163 = vsyncpa [#allocation3 + $0x1], 1 }
 0x830   :  { %1164 = vsyncpa [#allocation6], 1 }
 0x831   :  { %1165 = vsyncpa [#allocation4], 1 }
 0x832   :  { %1167 = vsyncpa [#allocation4 + $0x1], 1 }

</bundles_post_ra>
